<compile_context>
chip_gen: v7x
topology: tpu7x:2x2x1
jax: 0.10.0
libtpu: 0.0.40
codegen_flags: <defaults>
</compile_context>

<pallas_src>
import functools

import jax
import jax.numpy as jnp
from jax.experimental import pallas as pl
from jax.experimental.pallas import tpu as pltpu

REDUCTION = 16

_FUSED_VMEM_BUDGET = 40 << 20   # conservative: fits v7x's 64 MiB VMEM per TC
_VMEM_LIMIT_CAP = 48 << 20


def _round_up(x, m):
    return (x + m - 1) // m * m


# ---------------------------------------------------------------------------
# Fused path: pool + MLP + scale in one pass (x read from HBM exactly once).
# ---------------------------------------------------------------------------
def _fused_kernel(x_ref, w1t_ref, b1_ref, w2t_ref, b2_ref, alpha_ref, o_ref,
                  *, inv_hw):
    # x_ref: (1, C, HW) row, resident in VMEM for this grid step.
    pooled = jnp.sum(x_ref[...].astype(jnp.float32), axis=-1) * inv_hw  # (1, C)
    h = jnp.dot(pooled, w1t_ref[...],
                preferred_element_type=jnp.float32) + b1_ref[...]       # (1, R)
    a = alpha_ref[0]                                                    # SMEM scalar
    h = jnp.where(h >= 0.0, h, a * h)                                   # PReLU
    z = jnp.dot(h, w2t_ref[...],
                preferred_element_type=jnp.float32) + b2_ref[...]       # (1, C)
    gate = jax.nn.sigmoid(z)                                            # (1, C)
    o_ref[...] = (x_ref[...].astype(jnp.float32)
                  * gate[:, :, None]).astype(o_ref.dtype)


def _se_fused(x_flat, w1t, b1_, w2t, b2_, alpha_, HW, dtype, itemsize,
              fused_bytes):
    B, C, _ = x_flat.shape
    R = w1t.shape[1]
    vmem_limit = int(min(_VMEM_LIMIT_CAP,
                         max(16 << 20, fused_bytes + (4 << 20))))
    const2 = lambda b: (0, 0)
    return pl.pallas_call(
        functools.partial(_fused_kernel, inv_hw=1.0 / HW),
        grid=(B,),
        in_specs=[
            pl.BlockSpec((1, C, HW), lambda b: (b, 0, 0)),        # x row
            pl.BlockSpec((C, R), const2),                         # W1^T (resident)
            pl.BlockSpec((1, R), const2),                         # b1
            pl.BlockSpec((R, C), const2),                         # W2^T (resident)
            pl.BlockSpec((1, C), const2),                         # b2
            pl.BlockSpec(memory_space=pltpu.MemorySpace.SMEM),    # PReLU alpha
        ],
        out_specs=pl.BlockSpec((1, C, HW), lambda b: (b, 0, 0)),
        out_shape=jax.ShapeDtypeStruct((B, C, HW), dtype),
        compiler_params=pltpu.CompilerParams(
            dimension_semantics=("parallel",),
            vmem_limit_bytes=vmem_limit),
        cost_estimate=pl.CostEstimate(
            flops=int(2 * B * C * HW + 4 * B * C * R),
            transcendentals=int(B * C),
            bytes_accessed=int(2 * B * C * HW * itemsize + 2 * C * R * 4)),
        # TODO(synk): add input_output_aliases={0: 0} once callers can donate x.
    )(x_flat, w1t, b1_, w2t, b2_, alpha_)


# ---------------------------------------------------------------------------
# Two-pass fallback for rows that do not fit the fused VMEM budget.
# ---------------------------------------------------------------------------
def _pool_kernel(x_ref, pooled_ref, acc_ref, *, hw, tile):
    s = pl.program_id(1)
    ns = pl.num_programs(1)

    @pl.when(s == 0)
    def _():
        acc_ref[...] = jnp.zeros_like(acc_ref)

    def _accumulate(mask_tail):
        xv = x_ref[...].astype(jnp.float32)                       # (1, C, tile)
        if mask_tail:
            # OOB lanes of the ragged last block are unspecified -> mask them.
            lane = jax.lax.broadcasted_iota(jnp.int32, xv.shape, 2) + s * tile
            xv = jnp.where(lane < hw, xv, 0.0)
        # Per-step lane reduce (XLU, hidden under the HBM DMA) keeps the
        # accumulator tiny, freeing VMEM for larger streaming tiles.
        acc_ref[...] += jnp.sum(xv, axis=-1, keepdims=True)       # (1, C, 1)

    if hw % tile == 0:
        _accumulate(False)
    else:
        @pl.when(s < ns - 1)
        def _():
            _accumulate(False)

        @pl.when(s == ns - 1)
        def _():
            _accumulate(True)

    @pl.when(s == ns - 1)
    def _():
        pooled_ref[...] = acc_ref[...] * (1.0 / hw)               # (1, C, 1)


def _scale_kernel(x_ref, g_ref, o_ref):
    o_ref[...] = (x_ref[...].astype(jnp.float32) * g_ref[...]).astype(o_ref.dtype)


def _choose_tile(C, HW, itemsize, target_block_bytes=2 << 20):
    """Lane-dense spatial tile sized by bytes (~2 MiB of x per block)."""
    lanes = max(128, (target_block_bytes // (C * itemsize)) // 128 * 128)
    return int(min(lanes, _round_up(HW, 128)))


def _se_two_pass(x_flat, w1t, b1_, w2t, b2_, alpha_, HW, dtype, itemsize,
                 tile_override):
    B, C, _ = x_flat.shape
    tile = tile_override if tile_override is not None else _choose_tile(
        C, HW, itemsize)
    num_s = (HW + tile - 1) // tile

    blk_in = C * tile * itemsize
    blk_f32 = C * tile * 4
    vmem_limit = int(min(_VMEM_LIMIT_CAP,
                         max(16 << 20, 4 * blk_in + 2 * blk_f32 + (4 << 20))))

    # -- Pass 1: tiled global average pool (ragged tail handled in-kernel). --
    pooled = pl.pallas_call(
        functools.partial(_pool_kernel, hw=HW, tile=tile),
        grid=(B, num_s),
        in_specs=[pl.BlockSpec((1, C, tile), lambda b, s: (b, 0, s))],
        out_specs=pl.BlockSpec((1, C, 1), lambda b, s: (b, 0, 0)),
        out_shape=jax.ShapeDtypeStruct((B, C, 1), jnp.float32),
        scratch_shapes=[pltpu.VMEM((1, C, 1), jnp.float32)],
        compiler_params=pltpu.CompilerParams(
            dimension_semantics=("parallel", "arbitrary"),
            vmem_limit_bytes=vmem_limit),
        cost_estimate=pl.CostEstimate(
            flops=int(B * C * HW),
            transcendentals=0,
            bytes_accessed=int(B * C * HW * itemsize + B * C * 4)),
    )(x_flat)

    # -- Excitation MLP: batched over B in plain XLA (negligible FLOPs). -----
    p = pooled[:, :, 0]                                   # (B, C)
    h = p @ w1t + b1_                                     # (B, R)
    h = jnp.where(h >= 0.0, h, alpha_[0] * h)             # PReLU
    gate = jax.nn.sigmoid(h @ w2t + b2_)                  # (B, C)
    gate = gate[:, :, None]                               # (B, C, 1)

    # -- Pass 2: streaming channel-wise scale (gate VMEM-resident per row). --
    out = pl.pallas_call(
        _scale_kernel,
        grid=(B, num_s),
        in_specs=[
            pl.BlockSpec((1, C, tile), lambda b, s: (b, 0, s)),   # x tile
            pl.BlockSpec((1, C, 1), lambda b, s: (b, 0, 0)),      # gate
        ],
        out_specs=pl.BlockSpec((1, C, tile), lambda b, s: (b, 0, s)),
        out_shape=jax.ShapeDtypeStruct((B, C, HW), dtype),
        compiler_params=pltpu.CompilerParams(
            dimension_semantics=("parallel", "parallel"),
            vmem_limit_bytes=vmem_limit),
        cost_estimate=pl.CostEstimate(
            flops=int(B * C * HW),
            transcendentals=0,
            bytes_accessed=int(2 * B * C * HW * itemsize)),
        # TODO(synk): add input_output_aliases={0: 0} once callers can donate x.
    )(x_flat, gate)
    return out


# ---------------------------------------------------------------------------
# Public wrapper
# ---------------------------------------------------------------------------
def se_layer(x_nchw, w1, b1, alpha, w2, b2, *,
             force_two_pass=False, _tile_override=None):
    """x_nchw: (B, C, H, W). Weights follow PyTorch Linear layout (out, in)."""
    B, C, H, W = x_nchw.shape
    R = w1.shape[0]
    dtype = x_nchw.dtype
    itemsize = jnp.dtype(dtype).itemsize
    HW = H * W

    x_flat = x_nchw.reshape(B, C, HW)

    # Pre-transpose weights so both paths compute (.,C)@(C,R) and (.,R)@(R,C).
    w1t = jnp.asarray(w1, jnp.float32).T          # (C, R)
    w2t = jnp.asarray(w2, jnp.float32).T          # (R, C)
    b1_ = jnp.asarray(b1, jnp.float32).reshape(1, R)
    b2_ = jnp.asarray(b2, jnp.float32).reshape(1, C)
    alpha_ = jnp.asarray(alpha, jnp.float32).reshape(1)

    # Conservative VMEM footprint of the fused path: double-buffered in + out
    # row blocks plus f32 temporaries plus weights/slack.
    row_in = C * HW * itemsize
    row_f32 = C * HW * 4
    fused_bytes = 4 * row_in + 2 * row_f32 + (2 << 20)

    if not force_two_pass and fused_bytes <= _FUSED_VMEM_BUDGET:
        out = _se_fused(x_flat, w1t, b1_, w2t, b2_, alpha_, HW, dtype,
                        itemsize, fused_bytes)
    else:
        out = _se_two_pass(x_flat, w1t, b1_, w2t, b2_, alpha_, HW, dtype,
                           itemsize, _tile_override)
    return out.reshape(B, C, H, W)


# ---------------------------------------------------------------------------
# Reference + self-test
# ---------------------------------------------------------------------------
def _reference(x, w1, b1, alpha, w2, b2):
    pooled = jnp.mean(x.astype(jnp.float32), axis=(2, 3))     # (B, C)
    h = pooled @ w1.T + b1
    h = jnp.where(h >= 0, h, alpha * h)
    y = jax.nn.sigmoid(h @ w2.T + b2)                         # (B, C)
    return (x.astype(jnp.float32) * y[:, :, None, None]).astype(x.dtype)


if __name__ == "__main__":
    key = jax.random.PRNGKey(0)
    k_x, k_w1, k_b1, k_w2, k_b2, k_x2, k_x3 = jax.random.split(key, 7)

    B, C = 2, 4
    R = REDUCTION

    # Deterministic params (shapes match nn.Linear(C,R), nn.PReLU(),
    # nn.Linear(R,C)); uniform ranges mimic PyTorch's default Linear init.
    bound1 = 1.0 / (C ** 0.5)
    w1 = jax.random.uniform(k_w1, (R, C), jnp.float32, -bound1, bound1)
    b1 = jax.random.uniform(k_b1, (R,), jnp.float32, -bound1, bound1)
    alpha = jnp.float32(0.25)          # nn.PReLU() default single parameter
    bound2 = 1.0 / (R ** 0.5)
    w2 = jax.random.uniform(k_w2, (C, R), jnp.float32, -bound2, bound2)
    b2 = jax.random.uniform(k_b2, (C,), jnp.float32, -bound2, bound2)

    # 1) Fused single-pass path, 128-aligned spatial size.
    x = jax.random.normal(k_x, (B, C, 16, 16), jnp.float32)
    out = jax.block_until_ready(se_layer(x, w1, b1, alpha, w2, b2))
    ref = _reference(x, w1, b1, alpha, w2, b2)
    assert out.shape == x.shape
    assert jnp.allclose(out, ref, atol=1e-5, rtol=1e-5)

    # 2) Fused path with a non-128-multiple spatial size (masked row I/O).
    x2 = jax.random.normal(k_x2, (B, C, 5, 7), jnp.float32)
    out2 = jax.block_until_ready(se_layer(x2, w1, b1, alpha, w2, b2))
    ref2 = _reference(x2, w1, b1, alpha, w2, b2)
    assert out2.shape == x2.shape
    assert jnp.allclose(out2, ref2, atol=1e-5, rtol=1e-5)

    # 3) Two-pass fallback with a forced small tile so the ragged-tail
    #    masking and partial final stores are exercised (HW=300, tile=128).
    x3 = jax.random.normal(k_x3, (B, C, 15, 20), jnp.float32)
    out3 = jax.block_until_ready(
        se_layer(x3, w1, b1, alpha, w2, b2,
                 force_two_pass=True, _tile_override=128))
    ref3 = _reference(x3, w1, b1, alpha, w2, b2)
    assert out3.shape == x3.shape
    assert jnp.allclose(out3, ref3, atol=1e-5, rtol=1e-5)

    print("KERNEL_OK")
</pallas_src>

<mosaic_0001>
module attributes {stable_mosaic.version = 11 : i64} {
  func.func @_fused_kernel(%arg0: i32, %arg1: memref<1x4x256xf32, #tpu.memory_space<vmem>>, %arg2: memref<4x16xf32, #tpu.memory_space<vmem>>, %arg3: memref<1x16xf32, #tpu.memory_space<vmem>>, %arg4: memref<16x4xf32, #tpu.memory_space<vmem>>, %arg5: memref<1x4xf32, #tpu.memory_space<vmem>>, %arg6: memref<1xf32, #tpu.memory_space<smem>>, %arg7: memref<1x4x256xf32, #tpu.memory_space<vmem>>) attributes {dimension_semantics = [#tpu.dimension_semantics<parallel>], iteration_bounds = array<i64: 2>, scalar_prefetch = 0 : i64, scratch_operands = 0 : i64, tpu.core_type = #tpu.core_type<tc>, window_params = [{transform_indices = @transform_0, window_bounds = array<i64: 1, 4, 256>}, {pipeline_mode = #tpu.pipeline_mode<synchronous>, transform_indices = @transform_1, window_bounds = array<i64: 4, 16>}, {pipeline_mode = #tpu.pipeline_mode<synchronous>, transform_indices = @transform_2, window_bounds = array<i64: 1, 16>}, {pipeline_mode = #tpu.pipeline_mode<synchronous>, transform_indices = @transform_3, window_bounds = array<i64: 16, 4>}, {pipeline_mode = #tpu.pipeline_mode<synchronous>, transform_indices = @transform_4, window_bounds = array<i64: 1, 4>}, {transform_indices = @transform_5, window_bounds = array<i64: 1>}, {transform_indices = @transform_6, window_bounds = array<i64: 1, 4, 256>}]} {
    %c0 = arith.constant 0 : index
    %c0_0 = arith.constant 0 : index
    %c0_1 = arith.constant 0 : index
    %0 = vector.load %arg1[%c0, %c0_0, %c0_1] : memref<1x4x256xf32, #tpu.memory_space<vmem>>, vector<1x4x256xf32>
    %cst = arith.constant dense<0.000000e+00> : vector<1x4xf32>
    %1 = vector.multi_reduction <add>, %0, %cst [2] : vector<1x4x256xf32> to vector<1x4xf32>
    %cst_2 = arith.constant 3.906250e-03 : f32
    %2 = vector.broadcast %cst_2 : f32 to vector<1x4xf32>
    %3 = arith.mulf %1, %2 : vector<1x4xf32>
    %c0_3 = arith.constant 0 : index
    %c0_4 = arith.constant 0 : index
    %4 = vector.load %arg2[%c0_3, %c0_4] : memref<4x16xf32, #tpu.memory_space<vmem>>, vector<4x16xf32>
    %cst_5 = arith.constant dense<0.000000e+00> : vector<1x16xf32>
    %5 = tpu.matmul %3, %4, %cst_5 {dimension_numbers = #tpu.dot_dimension_numbers<[1], [0], [0], [1], [0, 0, 1, 1], [], []>} : vector<1x4xf32>, vector<4x16xf32>, vector<1x16xf32> -> vector<1x16xf32>
    %c0_6 = arith.constant 0 : index
    %c0_7 = arith.constant 0 : index
    %6 = vector.load %arg3[%c0_6, %c0_7] : memref<1x16xf32, #tpu.memory_space<vmem>>, vector<1x16xf32>
    %7 = arith.addf %5, %6 : vector<1x16xf32>
    %c0_8 = arith.constant 0 : index
    %8 = memref.load %arg6[%c0_8] : memref<1xf32, #tpu.memory_space<smem>>
    %cst_9 = arith.constant 0.000000e+00 : f32
    %9 = vector.broadcast %cst_9 : f32 to vector<1x16xf32>
    %10 = arith.cmpf oge, %7, %9 : vector<1x16xf32>
    %11 = vector.broadcast %8 : f32 to vector<1x16xf32>
    %12 = arith.mulf %11, %7 : vector<1x16xf32>
    %13 = arith.select %10, %7, %12 : vector<1x16xi1>, vector<1x16xf32>
    %c0_10 = arith.constant 0 : index
    %c0_11 = arith.constant 0 : index
    %14 = vector.load %arg4[%c0_10, %c0_11] : memref<16x4xf32, #tpu.memory_space<vmem>>, vector<16x4xf32>
    %cst_12 = arith.constant dense<0.000000e+00> : vector<1x4xf32>
    %15 = tpu.matmul %13, %14, %cst_12 {dimension_numbers = #tpu.dot_dimension_numbers<[1], [0], [0], [1], [0, 0, 1, 1], [], []>} : vector<1x16xf32>, vector<16x4xf32>, vector<1x4xf32> -> vector<1x4xf32>
    %c0_13 = arith.constant 0 : index
    %c0_14 = arith.constant 0 : index
    %16 = vector.load %arg5[%c0_13, %c0_14] : memref<1x4xf32, #tpu.memory_space<vmem>>, vector<1x4xf32>
    %17 = arith.addf %15, %16 : vector<1x4xf32>
    %18 = arith.negf %17 : vector<1x4xf32>
    %19 = math.exp %18 : vector<1x4xf32>
    %cst_15 = arith.constant 1.000000e+00 : f32
    %20 = vector.broadcast %cst_15 : f32 to vector<1x4xf32>
    %21 = arith.addf %20, %19 : vector<1x4xf32>
    %22 = arith.divf %20, %21 : vector<1x4xf32>
    %c0_16 = arith.constant 0 : index
    %c0_17 = arith.constant 0 : index
    %c0_18 = arith.constant 0 : index
    %23 = vector.load %arg1[%c0_16, %c0_17, %c0_18] : memref<1x4x256xf32, #tpu.memory_space<vmem>>, vector<1x4x256xf32>
    %24 = vector.shape_cast %22 : vector<1x4xf32> to vector<1x4x1xf32>
    %25 = vector.broadcast %24 : vector<1x4x1xf32> to vector<1x4x256xf32>
    %26 = arith.mulf %23, %25 : vector<1x4x256xf32>
    %c0_19 = arith.constant 0 : index
    %c0_20 = arith.constant 0 : index
    %c0_21 = arith.constant 0 : index
    %27 = vector.load %arg7[%c0_19, %c0_20, %c0_21] : memref<1x4x256xf32, #tpu.memory_space<vmem>>, vector<1x4x256xf32>
    tpu.vector_store %arg7[%c0_19, %c0_20, %c0_21], %26 {strides = array<i32>} : memref<1x4x256xf32, #tpu.memory_space<vmem>>, vector<1x4x256xf32>,
    return
  }
  func.func @transform_0(%arg0: i32) -> (i32, i32, i32) {
    %c0_i32 = arith.constant 0 : i32
    %c0_i32_0 = arith.constant 0 : i32
    %c0_i32_1 = arith.constant 0 : i32
    return %arg0, %c0_i32, %c0_i32_0 : i32, i32, i32
  }
  func.func @transform_1(%arg0: i32) -> (i32, i32) {
    %c0_i32 = arith.constant 0 : i32
    %c0_i32_0 = arith.constant 0 : i32
    %c0_i32_1 = arith.constant 0 : i32
    return %c0_i32, %c0_i32_0 : i32, i32
  }
  func.func @transform_2(%arg0: i32) -> (i32, i32) {
    %c0_i32 = arith.constant 0 : i32
    %c0_i32_0 = arith.constant 0 : i32
    %c0_i32_1 = arith.constant 0 : i32
    return %c0_i32, %c0_i32_0 : i32, i32
  }
  func.func @transform_3(%arg0: i32) -> (i32, i32) {
    %c0_i32 = arith.constant 0 : i32
    %c0_i32_0 = arith.constant 0 : i32
    %c0_i32_1 = arith.constant 0 : i32
    return %c0_i32, %c0_i32_0 : i32, i32
  }
  func.func @transform_4(%arg0: i32) -> (i32, i32) {
    %c0_i32 = arith.constant 0 : i32
    %c0_i32_0 = arith.constant 0 : i32
    %c0_i32_1 = arith.constant 0 : i32
    return %c0_i32, %c0_i32_0 : i32, i32
  }
  func.func @transform_5(%arg0: i32) -> i32 {
    %c0_i32 = arith.constant 0 : i32
    %c0_i32_0 = arith.constant 0 : i32
    return %c0_i32 : i32
  }
  func.func @transform_6(%arg0: i32) -> (i32, i32, i32) {
    %c0_i32 = arith.constant 0 : i32
    %c0_i32_0 = arith.constant 0 : i32
    %c0_i32_1 = arith.constant 0 : i32
    return %arg0, %c0_i32, %c0_i32_0 : i32, i32, i32
  }
}

</mosaic_0001>

<bundles_post_ra>
// kernel: tpu_custom_call.1
= control target key start
LH: loop header
LB: loop body
LE: loop exit
PB: predicated region body
PF: predicated region fallthrough
CT: control target
= control target key end

     0   :  { %s841_s0 = inlined_call_operand.vmem [shape: f32[2,4,256], index: 0, kind: input, shape index: {}]   ;;  %s842_s1 = inlined_call_operand.vmem [shape: f32[4,16], index: 1, kind: input, shape index: {}]   ;;  %s843_s2 = inlined_call_operand.vmem [shape: f32[1,16], index: 2, kind: input, shape index: {}]   ;;  %s844_s3 = inlined_call_operand.vmem [shape: f32[16,4], index: 3, kind: input, shape index: {}]   ;;  %s845_s4 = inlined_call_operand.vmem [shape: f32[1,4], index: 4, kind: input, shape index: {}]   ;;  %s846_s5 = inlined_call_operand.<no memory space> [shape: f32[1], index: 5, kind: input, shape index: {}]   ;;  %s847_s6 = inlined_call_operand.hbm [shape: f32[2,4,256], index: 6, kind: output, shape index: {}]  }
   0x1   :  { %11 = sst [smem:[#allocation2]] %s846_s5 }
   0x2   :  { %12 = vsyncpa [#allocation4], 0 }
   0x3   :  { %14 = vsyncpa [#allocation4 + $0x1], 0  ;;  %s720_s23 = smov 0   ;;  %s722_s24 = smov 0  }
   0x4   :  { %s724_s25 = smov 0   ;;  %s726_s26 = smov 0  }
   0x5 LB: > { %s741_s5 = sadd.s32 4294967295, %s675_s26   ;;  %s527_s27 = sadd.s32 4294967294, %s675_s26   ;;  %s675_s26 = sphi %s726_s26, %s853_s26   ;;  %s671_s25 = sphi %s724_s25, %s852_s25   ;;  %s667_s24 = sphi %s722_s24, %s851_s24   ;;  %s663_s23 = sphi %s720_s23, %s850_s23  }
   0x6   : > { %s745_s28 = sadd.s32 1, %s675_s26   ;;  %s158_s29 = sadd.s32 1, %s671_s25 }
   0x7   : > { %s155_s30 = ssub.s32 %s675_s26, %s745_s28  ;;  %p168_p0 = scmp.ne.s32.totalorder %s671_s25, %s667_s24 }
   0x8   : > { %p156_p1 = scmp.eq.s32.totalorder %s155_s30, 0  ;;  %p169_p2 = scmp.eq.s32.totalorder %s741_s5, 1 }
   0x9   : > { %p174_p3 = scmp.ne.s32.totalorder %s667_s24, %s663_s23  ;;  %p175_p4 = scmp.eq.s32.totalorder %s527_s27, 1 }
   0xa   : > { %s756_s7 = scalar_select %p156_p1, %s671_s25, %s158_s29  }
   0xb   : > { %p758_p5 = por %p169_p2, %p168_p0  ;;  %p762_p6 = por %p175_p4, %p174_p3 }
   0xc   : > { %p530_p7 = scmp.ge.s32.totalorder %s675_s26, 1  ;;  %p216_p8 = scmp.lt.s32.totalorder %s675_s26, 3 }
   0xe   : > { %p217_p9 = pnand %p530_p7, %p216_p8 }
   0xf   : > { %p246_p10 = scmp.lt.s32.totalorder (!%p217_p9), %s741_s5, 1  ;;  %vm255_vm0 = vcmask (!%p217_p9), 1043456   ;;  %v677_v5 = vmov (!%p217_p9), 0.0   ;;  %v262_v6 = vld [vmem:[%s842_s1] sm:$0xf] (!%p217_p9)  ;;  %vm678_vm1 = vmmov (!%p217_p9), 0   ;;  %v265_v7 = vlaneseq (!%p217_p9) }
  0x10   : > { %220 = sbr.rel (%p217_p9) target bundleno = 771 (0x303), region = 44  ;;  %550 = vmatprep.subr.mxu0 (!%p217_p9), %v677_v5  ;;  %552 = vmatprep.mubr.msk.f32.mxu0 (!%p217_p9), %vm678_vm1, %v677_v5  ;;  %vm271_vm2 = vcmask (!%p217_p9), 31744   ;;  %v352_v14 = vld [vmem:[%s844_s3] sm:$0xff] (!%p217_p9)  ;;  %v353_v15 = vld [vmem:[%s844_s3 + $0x8] sm:$0xff] (!%p217_p9)  ;;  %v679_v17 = vmov (!%p217_p9), 0.0|0.0   ;;  %s347_s21 = sld [smem:[#allocation2]] (!%p217_p9) }
  0x11   : > { %551 = vmatpush3.msk.msra.mxu0 (!%p217_p9), %vm255_vm0, %v262_v6  ;;  %559 = vmatprep.mubr.msk.f32.mxu1 (!%p217_p9), %vm678_vm1, %v677_v5  ;;  %v266_v8 = vand.u32 (!%p217_p9), 127, %v265_v7  ;;  %v268_v9 = vshrl.u32 (!%p217_p9), %v265_v7, 7  ;;  %v563_v16 = vpack.c.bf16 (!%p217_p9), %v353_v15, %v352_v14  ;;  %v263_v18 = vld [vmem:[%s843_s2] sm:$0x1] (!%p217_p9)  ;;  %vm355_vm4 = vcmask (!%p217_p9), 130048   ;;  %s544_s12 = sshll.u32 (!%p217_p9), %s741_s5, 7 }
  0x12   : > { %562 = vmatprep.subr.bf16.mxu1 (!%p217_p9), %v679_v17  ;;  %v354_v25 = vld [vmem:[%s845_s4] sm:$0x1] (!%p217_p9)  ;;  %v680_v35 = vmov (!%p217_p9), 839922192   ;;  %s799_s17 = scalar_lea.hbm (!%p217_p9), %s847_s6, %s544_s12 }
  0x13   : > { %v269_v10 = vsub.s32 (!%p217_p9), %v266_v8, %v268_v9  ;;  %564 = vmatpush3.bf16.msra.mxu1 (!%p217_p9), %v563_v16  ;;  %v437_v32 = vsub.s32 (!%p217_p9), 0, %v268_v9  ;;  %v444_v36 = vunpack.c.l.s4 (!%p217_p9), %v680_v35 }
  0x15   : > { %v445_v37 = vunpack.c.0.s8 (!%p217_p9), %v444_v36 }
  0x16   : > { %v349_v20 = vstv (!%p217_p9), %s347_s21 }
  0x17   : > { %s247_s10 = scalar_select %p246_p10, %s741_s5, 1  ;;  %v448_v38 = vsub.s32 %v445_v37, %v268_v9 }
  0x18   : > { %s681_s5 = smov [#allocation3]  }
  0x19   : > { %s543_s11 = sshll.u32 %s247_s10, 3  ;;  %s243_s10 = sand.u32 1, %s667_s24  }
  0x1a   : > { %s250_s14 = scalar_lea.vmem %s841_s0, %s543_s11  ;;  %s531_s11 = sshll.u32 %s243_s10, 3 }
  0x1b   : > { %v773_v0 = vld [vmem:[%s250_s14] sm:$0xff]  ;;  %s245_s13 = scalar_lea.vmem [#allocation3], %s531_s11  ;;  %s454_s18 = scalar_lea.sflag [#allocation4], %s243_s10 }
  0x1c   : > { %v253_v1 = vcombine.high %v773_v0, %v773_v0  ;;  %v256_v2 = vsel %vm255_vm0, %v773_v0, 0.0  ;;  %s468_s14 = sshll.u32 %s245_s13, 4  ;;  %s617_s20 = sshll.u32 %s681_s5, 4  ;;  %s801_s14 = int_to_ptr.vmem [resolvable:$true] %s468_s14  ;;  %s618_s20 = int_to_ptr.vmem [resolvable:$false] %s617_s20 }
  0x1d   : > { %s613_s19 = scalar_lea.vmem %s801_s14, 128  ;;  %s619_s21 = scalar_lea.vmem %s618_s20, 256 }
  0x1e   : > { %v257_v3 = vsel %vm255_vm0, %v253_v1, 0.0  ;;  %p614_p11 = scmp.ne.s32.totalorder %s801_s14, %s613_s19  ;;  %p620_p0 = scmp.lt.s32.totalorder %s801_s14, %s618_s20 }
  0x1f   : > { %v258_v4 = vadd.f32 %v257_v3, %v256_v2  ;;  %p621_p1 = scmp.lt.s32.totalorder %s619_s21, %s613_s19 }
  0x20   : > { %p615_p12 = pnand %p614_p11, %p758_p5 }
  0x21   : > { %259 = vadd.xlane.f32.xlu0 %v258_v4  ;;  %p622_p2 = por %p621_p1, %p620_p0 }
  0x22   : > { %p616_p13 = pneg %p615_p12 }
  0x24   : > { %p623_p3 = pnand %p622_p2, %p616_p13 }
  0xae   : > { %v260_v11 = vpop.xlane.xlu0 %259 }
  0xaf   : > { %v261_v12 = vmul.f32 0.00390625, %v260_v11 }
  0xb1   : > { %v270_v13 = vrot.slane %v261_v12, %v269_v10 }
  0xb3   : > { %553 = vmatmul.mubr.msk.f32.vlgmr.msra.gmra.mrb[0].mxu0 %vm271_vm2, %v270_v13 }
 0x186   : > { %v343_v19 = vpop.f32.mrb[0].mxu0 }
 0x187   : > { %v344_v21 = vadd.f32 %v343_v19, %v263_v18  ;;  %v554_v22 = vpop.f32.mrb[1].mxu0 }
 0x189   : > { %vm348_vm3 = vcmp.ge.f32.partialorder %v344_v21, 0.0  ;;  %v350_v23 = vmul.f32 %v349_v20, %v344_v21 }
 0x18b   : > { %v351_v24 = vsel %vm348_vm3, %v344_v21, %v350_v23 }
 0x18c   : > { %560 = vmatmul.mubr.msk.f32.vlgmr.msra.gmra.mrb[0].mxu1 %vm355_vm4, %v351_v24 }
 0x25f   : > { %v425_v26 = vpop.f32.mrb[0].mxu1 }
 0x260   : > { %v426_v27 = vadd.f32 %v425_v26, %v354_v25  ;;  %v561_v28 = vpop.f32.mrb[1].mxu1 }
 0x262   : > { %v537_v29 = vmul.f32 -1.442695, %v426_v27 }
 0x264   : > { %609 = vpow2.f32 %v537_v29 }
 0x26e   : > { %v610_v30 = vpop.eup %609 }
 0x26f   : > { %v432_v31 = vadd.f32 1.0, %v610_v30 }
 0x271   : > { %611 = vrcp.f32 %v432_v31 }
 0x27b   : > { %v612_v33 = vpop.eup %611 }
 0x27c   : > { %v438_v34 = vrot.slane %v612_v33, %v437_v32 }
 0x27e   : > { %440 = vbcast.lane.b32.xlu0 %v438_v34, 256 }
 0x2f0   : > { %v441_v39 = vpop.permute.xlu0 %440 }
 0x2f1   : > { %v449_v40 = vrot.slane %v441_v39, %v448_v38 }
 0x2f3   : > { %v451_v41 = vmul.f32 %v449_v40, %v773_v0 }
 0x2f5   : > { %452 = vst [vmem:[%s245_s13] sm:$0xff] %v451_v41 }
 0x2f6   : > { %626 = shalt.err (!%p623_p3)
}
 0x2f7   : > { %s627_s22 = scalar_lea.hbm %s799_s17, 128  ;;  %s631_s30 = scalar_lea.hbm %s847_s6, 256 }
 0x2f8   : > { %p628_p4 = scmp.ne.s32.totalorder %s799_s17, %s627_s22  ;;  %p632_p9 = scmp.lt.u32.totalorder %s799_s17, %s847_s6 }
 0x2f9   : > { %p633_p10 = scmp.lt.u32.totalorder %s631_s30, %s627_s22  ;;  %p635_p12 = scmp.lt.u32.totalorder %s627_s22, %s799_s17 }
 0x2fa   : > { %p629_p7 = pnand %p628_p4, %p758_p5 }
 0x2fb   : > { %p634_p11 = por %p633_p10, %p632_p9 }
 0x2fc   : > { %p630_p8 = pneg %p629_p7 }
 0x2fd   : > { %p636_p13 = por %p635_p12, %p634_p11 }
 0x2ff   : > { %p637_p0 = pnand %p636_p13, %p630_p8 }
 0x301   : > { %640 = shalt.err (!%p637_p0)
}
 0x302   : > { %565 = dma.vmem_to_hbm [thread:$0]  (%p758_p5), %s801_s14, 128, %s799_s17, %s454_s18  }
 0x303 PF: > { %p571_p1 = scmp.ge.s32.totalorder %s675_s26, 2  ;;  %s480_s12 = sand.u32 1, %s663_s23  }
 0x304   : > { %s481_s13 = scalar_lea.sflag [#allocation4], %s480_s12 }
 0x305   : > { %p568_p2 = pnand %p571_p1, %p762_p6 }
 0x307   : > { %658 = dma.done.wait (!%p568_p2), %s481_s13, 128  }
 0x308   : > { %660 = vsyncadd (!%p568_p2), %s481_s13, 4294967168  ;;  %p17_p3 = scmp.ge.s32.totalorder %s745_s28, 4   ;;  %s850_s23 = smov %s667_s24 }
 0x309   : > { %s851_s24 = smov %s671_s25  ;;  %s852_s25 = smov %s756_s7 }
 0x30a   : > { %s853_s26 = smov %s745_s28  ;;  %19 = sbr.rel (!%p17_p3) target bundleno = 5 (0x5), region = 79 }
 0x311   :  { %486 = vsyncpa [#allocation4], 1 }
 0x312   :  { %488 = vsyncpa [#allocation4 + $0x1], 1 }

</bundles_post_ra>
